<compile_context>
chip_gen: v5e
topology: v5e:2x2
jax: 0.10.0
libtpu: 0.0.40
codegen_flags: <defaults>
</compile_context>

<pallas_src>
import jax
import jax.numpy as jnp
from jax.experimental import pallas as pl
from jax.experimental.pallas import tpu as pltpu


def _round_up(v, m):
    return (v + m - 1) // m * m


def ann1layer_kernel(x_ref, w1_ref, b1_ref, w2_ref, b2_ref, o_ref):
    # hidden = sigmoid(x @ W1 + b1); matmul in compute dtype, accumulate in f32.
    h = jnp.dot(x_ref[...], w1_ref[...], preferred_element_type=jnp.float32)
    h = h + b1_ref[...]                       # (TB, H) + (1, H): f32 VPU add
    # sigmoid via EUP: exp + approximate reciprocal (both on the EUP slot).
    e = jnp.exp(-h)
    h = pl.reciprocal(1.0 + e, approx=True)
    # y = hidden @ W2 + b2 (no activation on output, matching the module).
    h = h.astype(w2_ref.dtype)                # feed MXU in the compute dtype
    y = jnp.dot(h, w2_ref[...], preferred_element_type=jnp.float32)
    y = y + b2_ref[...]                       # (TB, N) + (1, N)
    o_ref[...] = y.astype(o_ref.dtype)


def _pick_block_batch(B, K, H, N, x_bytes):
    """Batch tile: multiple of 8, capped so double-buffered tiles + resident
    weights fit a conservative VMEM budget (safe for v5e's 16 MiB scoped
    default and v7x's 64 MiB physical VMEM)."""
    budget = 12 * 1024 * 1024
    resident = 2 * ((K * H + H * N) * x_bytes + (H + N) * 4)   # weights+biases, 2 bufs
    budget = max(budget - resident, 1 * 1024 * 1024)
    # per batch row: 2x x tile (double buffer) + 2x out tile + f32 hidden temps
    per_row = 2 * K * x_bytes + 2 * N * 4 + H * 4 + H * x_bytes
    tb = budget // max(per_row, 1)
    tb = max(8, min(1024, (tb // 8) * 8))
    tb = min(tb, _round_up(B, 8))
    return max(8, tb)


def ann1layer_forward(x, w1, b1, w2, b2, *, compute_dtype=jnp.float32,
                      block_batch=None):
    """Forward pass of ANN1layer.

    x : (B, n_inputs) float32
    w1: (neurons, n_inputs), b1: (neurons,)     -- torch.nn.Linear layout
    w2: (n_classes, neurons), b2: (n_classes,)
    Returns (B, n_classes) float32 logits.
    """
    B, n_in = x.shape
    neurons, n_classes = w1.shape[0], w2.shape[0]

    # Lane-dense padding: last dims -> multiples of 128, batch -> multiple of tile.
    K = _round_up(n_in, 128)
    H = _round_up(neurons, 128)
    N = _round_up(n_classes, 128)

    x_bytes = jnp.dtype(compute_dtype).itemsize
    TB = block_batch if block_batch is not None else _pick_block_batch(B, K, H, N, x_bytes)
    TB = max(8, (TB // 8) * 8)
    B_p = _round_up(B, TB)
    nb = B_p // TB

    # Zero-padded, pre-transposed operands. Padded W2 *rows* are zero so the
    # sigmoid(0)=0.5 values in padded hidden columns contribute nothing.
    x_p = jnp.zeros((B_p, K), compute_dtype).at[:B, :n_in].set(x.astype(compute_dtype))
    w1_p = jnp.zeros((K, H), compute_dtype).at[:n_in, :neurons].set(w1.T.astype(compute_dtype))
    b1_p = jnp.zeros((1, H), jnp.float32).at[0, :neurons].set(b1.astype(jnp.float32))
    w2_p = jnp.zeros((H, N), compute_dtype).at[:neurons, :n_classes].set(w2.T.astype(compute_dtype))
    b2_p = jnp.zeros((1, N), jnp.float32).at[0, :n_classes].set(b2.astype(jnp.float32))

    cost = pl.CostEstimate(
        flops=2 * B_p * (K * H + H * N),
        transcendentals=B_p * H,
        bytes_accessed=(x_p.size * x_bytes + w1_p.size * x_bytes + w2_p.size * x_bytes
                        + b1_p.size * 4 + b2_p.size * 4 + B_p * N * 4),
    )

    out_p = pl.pallas_call(
        ann1layer_kernel,
        out_shape=jax.ShapeDtypeStruct((B_p, N), jnp.float32),
        grid=(nb,),
        in_specs=[
            pl.BlockSpec((TB, K), lambda i: (i, 0)),   # x: tiled over batch
            pl.BlockSpec((K, H), lambda i: (0, 0)),    # W1: resident
            pl.BlockSpec((1, H), lambda i: (0, 0)),    # b1: resident
            pl.BlockSpec((H, N), lambda i: (0, 0)),    # W2: resident
            pl.BlockSpec((1, N), lambda i: (0, 0)),    # b2: resident
        ],
        out_specs=pl.BlockSpec((TB, N), lambda i: (i, 0)),
        compiler_params=pltpu.CompilerParams(
            dimension_semantics=("parallel",)),        # megacore-shard batch tiles
        cost_estimate=cost,
    )(x_p, w1_p, b1_p, w2_p, b2_p)

    return out_p[:B, :n_classes]


def init_params(key, n_inputs, n_classes, neurons):
    """Deterministic init mimicking torch.nn.Linear (uniform +/- 1/sqrt(fan_in))."""
    k1, k2, k3, k4 = jax.random.split(key, 4)
    lim1 = 1.0 / jnp.sqrt(jnp.float32(n_inputs))
    lim2 = 1.0 / jnp.sqrt(jnp.float32(neurons))
    w1 = jax.random.uniform(k1, (neurons, n_inputs), jnp.float32, -lim1, lim1)
    b1 = jax.random.uniform(k2, (neurons,), jnp.float32, -lim1, lim1)
    w2 = jax.random.uniform(k3, (n_classes, neurons), jnp.float32, -lim2, lim2)
    b2 = jax.random.uniform(k4, (n_classes,), jnp.float32, -lim2, lim2)
    return w1, b1, w2, b2


if __name__ == "__main__":
    key = jax.random.PRNGKey(0)
    batch, n_inputs, neurons, n_classes = 8, 16, 32, 2

    kx, kp = jax.random.split(key)
    x = jax.random.normal(kx, (batch, n_inputs), jnp.float32)
    w1, b1, w2, b2 = init_params(kp, n_inputs, n_classes, neurons)

    # Reference in plain JAX (same math as the PyTorch forward).
    ref = jax.nn.sigmoid(x @ w1.T + b1) @ w2.T + b2

    # f32 MXU path (v5e-friendly). approx reciprocal => slightly looser tolerance.
    y32 = jax.block_until_ready(
        ann1layer_forward(x, w1, b1, w2, b2, compute_dtype=jnp.float32))
    assert y32.shape == (batch, n_classes)
    assert jnp.allclose(y32, ref, atol=5e-3, rtol=5e-3)

    # bf16 MXU path (v6e/v7x preferred): f32 accumulation, f32 bias/sigmoid.
    ybf = jax.block_until_ready(
        ann1layer_forward(x, w1, b1, w2, b2, compute_dtype=jnp.bfloat16))
    assert ybf.shape == (batch, n_classes)
    assert jnp.allclose(ybf, ref, atol=3e-2, rtol=3e-2)

    print("KERNEL_OK")
</pallas_src>

<mosaic_0001>
module attributes {stable_mosaic.version = 11 : i64} {
  func.func @ann1layer_kernel(%arg0: i32, %arg1: memref<8x128xf32, #tpu.memory_space<vmem>>, %arg2: memref<128x128xf32, #tpu.memory_space<vmem>>, %arg3: memref<1x128xf32, #tpu.memory_space<vmem>>, %arg4: memref<128x128xf32, #tpu.memory_space<vmem>>, %arg5: memref<1x128xf32, #tpu.memory_space<vmem>>, %arg6: memref<8x128xf32, #tpu.memory_space<vmem>>) attributes {dimension_semantics = [#tpu.dimension_semantics<parallel>], iteration_bounds = array<i64: 1>, scalar_prefetch = 0 : i64, scratch_operands = 0 : i64, tpu.core_type = #tpu.core_type<tc>, window_params = [{transform_indices = @transform_0, window_bounds = array<i64: 8, 128>}, {pipeline_mode = #tpu.pipeline_mode<synchronous>, transform_indices = @transform_1, window_bounds = array<i64: 128, 128>}, {pipeline_mode = #tpu.pipeline_mode<synchronous>, transform_indices = @transform_2, window_bounds = array<i64: 1, 128>}, {pipeline_mode = #tpu.pipeline_mode<synchronous>, transform_indices = @transform_3, window_bounds = array<i64: 128, 128>}, {pipeline_mode = #tpu.pipeline_mode<synchronous>, transform_indices = @transform_4, window_bounds = array<i64: 1, 128>}, {transform_indices = @transform_5, window_bounds = array<i64: 8, 128>}]} {
    %c0 = arith.constant 0 : index
    %c0_0 = arith.constant 0 : index
    %0 = vector.load %arg1[%c0, %c0_0] : memref<8x128xf32, #tpu.memory_space<vmem>>, vector<8x128xf32>
    %c0_1 = arith.constant 0 : index
    %c0_2 = arith.constant 0 : index
    %1 = vector.load %arg2[%c0_1, %c0_2] : memref<128x128xf32, #tpu.memory_space<vmem>>, vector<128x128xf32>
    %cst = arith.constant dense<0.000000e+00> : vector<8x128xf32>
    %2 = tpu.matmul %0, %1, %cst {dimension_numbers = #tpu.dot_dimension_numbers<[1], [0], [0], [1], [0, 0, 1, 1], [], []>} : vector<8x128xf32>, vector<128x128xf32>, vector<8x128xf32> -> vector<8x128xf32>
    %c0_3 = arith.constant 0 : index
    %c0_4 = arith.constant 0 : index
    %3 = vector.load %arg3[%c0_3, %c0_4] : memref<1x128xf32, #tpu.memory_space<vmem>>, vector<1x128xf32>
    %4 = vector.broadcast %3 : vector<1x128xf32> to vector<8x128xf32>
    %5 = arith.addf %2, %4 : vector<8x128xf32>
    %cst_5 = arith.constant 0.000000e+00 : f32
    %6 = vector.broadcast %cst_5 : f32 to vector<8x128xf32>
    %7 = arith.subf %6, %5 : vector<8x128xf32>
    %8 = math.exp %7 : vector<8x128xf32>
    %cst_6 = arith.constant 1.000000e+00 : f32
    %9 = vector.broadcast %cst_6 : f32 to vector<8x128xf32>
    %10 = arith.addf %9, %8 : vector<8x128xf32>
    %11 = tpu.reciprocal %10 {approx = true} : vector<8x128xf32> -> vector<8x128xf32>
    %c0_7 = arith.constant 0 : index
    %c0_8 = arith.constant 0 : index
    %12 = vector.load %arg4[%c0_7, %c0_8] : memref<128x128xf32, #tpu.memory_space<vmem>>, vector<128x128xf32>
    %cst_9 = arith.constant dense<0.000000e+00> : vector<8x128xf32>
    %13 = tpu.matmul %11, %12, %cst_9 {dimension_numbers = #tpu.dot_dimension_numbers<[1], [0], [0], [1], [0, 0, 1, 1], [], []>} : vector<8x128xf32>, vector<128x128xf32>, vector<8x128xf32> -> vector<8x128xf32>
    %c0_10 = arith.constant 0 : index
    %c0_11 = arith.constant 0 : index
    %14 = vector.load %arg5[%c0_10, %c0_11] : memref<1x128xf32, #tpu.memory_space<vmem>>, vector<1x128xf32>
    %15 = vector.broadcast %14 : vector<1x128xf32> to vector<8x128xf32>
    %16 = arith.addf %13, %15 : vector<8x128xf32>
    %c0_12 = arith.constant 0 : index
    %c0_13 = arith.constant 0 : index
    %17 = vector.load %arg6[%c0_12, %c0_13] : memref<8x128xf32, #tpu.memory_space<vmem>>, vector<8x128xf32>
    tpu.vector_store %arg6[%c0_12, %c0_13], %16 {strides = array<i32>} : memref<8x128xf32, #tpu.memory_space<vmem>>, vector<8x128xf32>,
    return
  }
  func.func @transform_0(%arg0: i32) -> (i32, i32) {
    %c0_i32 = arith.constant 0 : i32
    %c0_i32_0 = arith.constant 0 : i32
    return %arg0, %c0_i32 : i32, i32
  }
  func.func @transform_1(%arg0: i32) -> (i32, i32) {
    %c0_i32 = arith.constant 0 : i32
    %c0_i32_0 = arith.constant 0 : i32
    %c0_i32_1 = arith.constant 0 : i32
    return %c0_i32, %c0_i32_0 : i32, i32
  }
  func.func @transform_2(%arg0: i32) -> (i32, i32) {
    %c0_i32 = arith.constant 0 : i32
    %c0_i32_0 = arith.constant 0 : i32
    %c0_i32_1 = arith.constant 0 : i32
    return %c0_i32, %c0_i32_0 : i32, i32
  }
  func.func @transform_3(%arg0: i32) -> (i32, i32) {
    %c0_i32 = arith.constant 0 : i32
    %c0_i32_0 = arith.constant 0 : i32
    %c0_i32_1 = arith.constant 0 : i32
    return %c0_i32, %c0_i32_0 : i32, i32
  }
  func.func @transform_4(%arg0: i32) -> (i32, i32) {
    %c0_i32 = arith.constant 0 : i32
    %c0_i32_0 = arith.constant 0 : i32
    %c0_i32_1 = arith.constant 0 : i32
    return %c0_i32, %c0_i32_0 : i32, i32
  }
  func.func @transform_5(%arg0: i32) -> (i32, i32) {
    %c0_i32 = arith.constant 0 : i32
    %c0_i32_0 = arith.constant 0 : i32
    return %arg0, %c0_i32 : i32, i32
  }
}

</mosaic_0001>

<bundles_post_ra>
// kernel: tpu_custom_call.1
= control target key start
LH: loop header
LB: loop body
LE: loop exit
PB: predicated region body
PF: predicated region fallthrough
CT: control target
= control target key end

     0   :  { %10 = vsyncpa [#allocation3], 0  ;;  %s339_s0 = inlined_call_operand.hbm [shape: f32[8,128], index: 0, kind: input, shape index: {}]   ;;  %s340_s1 = inlined_call_operand.hbm [shape: f32[128,128], index: 1, kind: input, shape index: {}]   ;;  %s341_s2 = inlined_call_operand.vmem [shape: f32[1,128], index: 2, kind: input, shape index: {}]   ;;  %s342_s3 = inlined_call_operand.hbm [shape: f32[128,128], index: 3, kind: input, shape index: {}]   ;;  %s343_s4 = inlined_call_operand.vmem [shape: f32[1,128], index: 4, kind: input, shape index: {}]   ;;  %s344_s5 = inlined_call_operand.hbm [shape: f32[8,128], index: 5, kind: output, shape index: {}]  }
   0x1   :  { %11 = vsyncpa [#allocation6], 0  ;;  %s28_s20 = sshll.u32 %s340_s1, 4  ;;  %s29_s20 = int_to_ptr.hbm [resolvable:$true] %s28_s20 }
   0x2   :  { %12 = vsyncpa [#allocation4], 0  ;;  %s285_s21 = smov [#allocation5]   ;;  %s18_s25 = sshll.u32 %s339_s0, 4  ;;  %s19_s25 = int_to_ptr.hbm [resolvable:$true] %s18_s25 }
   0x3   :  { %s30_s22 = sshll.u32 %s285_s21, 4  ;;  %s286_s26 = smov 128   ;;  %s31_s22 = int_to_ptr.vmem [resolvable:$true] %s30_s22 }
   0x4   :  { %s287_s27 = smov 8   ;;  %s288_s28 = smov [#allocation2]  }
   0x5   :  { %36 = dma.hbm_to_vmem [thread:$0]  %s29_s20, 2048, %s31_s22, [#allocation6], %s286_s26, %s286_s26, %s287_s27  }
   0x6   :  { %s20_s29 = sshll.u32 %s288_s28, 4  ;;  %s43_s7 = sshll.u32 %s342_s3, 4  ;;  %s21_s29 = int_to_ptr.vmem [resolvable:$true] %s20_s29  ;;  %s44_s7 = int_to_ptr.hbm [resolvable:$true] %s43_s7 }
   0x7   :  { %23 = dma.hbm_to_vmem [thread:$0]  %s19_s25, 128, %s21_s29, [#allocation3]  }
   0x8   :  { %s289_s1 = smov [#allocation7]  }
   0x9   :  { %s45_s8 = sshll.u32 %s289_s1, 4  ;;  %s46_s8 = int_to_ptr.vmem [resolvable:$true] %s45_s8 }
   0xa   :  { %51 = dma.hbm_to_vmem [thread:$0]  %s44_s7, 2048, %s46_s8, [#allocation6], %s286_s26, %s286_s26, %s287_s27  }
   0xb   :  { %279 = dma.done.wait [#allocation3], 128  }
   0xc   :  { %280 = vsyncadd [#allocation3], 4294967168 }
   0xd   :  { %281 = dma.done.wait [#allocation6], 4096  }
   0xe   :  { %282 = vsyncadd [#allocation6], 4294963200  ;;  %v82_v0 = vld [vmem:[#allocation5 + $0x78] sm:$0xff]  ;;  %v81_v1 = vld [vmem:[#allocation5 + $0x70] sm:$0xff]  ;;  %s290_s11 = smov [#allocation8]  }
   0xf   :  { %87 = vmatpush.msra.mxu0 %v82_v0  ;;  %v80_v2 = vld [vmem:[#allocation5 + $0x68] sm:$0xff]  ;;  %v79_v3 = vld [vmem:[#allocation5 + $0x60] sm:$0xff]  ;;  %v127_v4 = vld [vmem:[#allocation7 + $0x78] sm:$0xff]  ;;  %s158_s12 = sshll.u32 %s290_s11, 4  ;;  %s159_s12 = int_to_ptr.vmem [resolvable:$true] %s158_s12 }
  0x10   :  { %v78_v5 = vld [vmem:[#allocation5 + $0x58] sm:$0xff]  ;;  %132 = vmatpush.msra.mxu1 %v127_v4  ;;  %v126_v6 = vld [vmem:[#allocation7 + $0x70] sm:$0xff]  ;;  %v125_v7 = vld [vmem:[#allocation7 + $0x68] sm:$0xff] }
  0x11   :  { %88 = vmatpush.msra.mxu0 %v81_v1  ;;  %v77_v8 = vld [vmem:[#allocation5 + $0x50] sm:$0xff]  ;;  %v124_v9 = vld [vmem:[#allocation7 + $0x60] sm:$0xff]  ;;  %v76_v10 = vld [vmem:[#allocation5 + $0x48] sm:$0xff] }
  0x12   :  { %133 = vmatpush.msra.mxu1 %v126_v6  ;;  %v75_v11 = vld [vmem:[#allocation5 + $0x40] sm:$0xff]  ;;  %v74_v12 = vld [vmem:[#allocation5 + $0x38] sm:$0xff]  ;;  %v73_v13 = vld [vmem:[#allocation5 + $0x30] sm:$0xff] }
  0x13   :  { %89 = vmatpush.msra.mxu0 %v80_v2  ;;  %v72_v14 = vld [vmem:[#allocation5 + $0x28] sm:$0xff]  ;;  %v71_v15 = vld [vmem:[#allocation5 + $0x20] sm:$0xff]  ;;  %v70_v16 = vld [vmem:[#allocation5 + $0x18] sm:$0xff] }
  0x14   :  { %134 = vmatpush.msra.mxu1 %v125_v7  ;;  %v69_v17 = vld [vmem:[#allocation5 + $0x10] sm:$0xff]  ;;  %v68_v18 = vld [vmem:[#allocation5 + $0x8] sm:$0xff]  ;;  %v67_v19 = vld [vmem:[#allocation5] sm:$0xff] }
  0x15   :  { %90 = vmatpush.msra.mxu0 %v79_v3  ;;  %v66_v20 = vld [vmem:[#allocation2] sm:$0xff]  ;;  %v122_v22 = vld [vmem:[#allocation7 + $0x50] sm:$0xff]  ;;  %v121_v23 = vld [vmem:[#allocation7 + $0x48] sm:$0xff] }
  0x16   :  { %135 = vmatpush.msra.mxu1 %v124_v9  ;;  %v123_v21 = vld [vmem:[#allocation7 + $0x58] sm:$0xff]  ;;  %v120_v24 = vld [vmem:[#allocation7 + $0x40] sm:$0xff]  ;;  %v118_v26 = vld [vmem:[#allocation7 + $0x30] sm:$0xff] }
  0x17   :  { %91 = vmatpush.msra.mxu0 %v78_v5  ;;  %v119_v25 = vld [vmem:[#allocation7 + $0x38] sm:$0xff]  ;;  %v117_v27 = vld [vmem:[#allocation7 + $0x28] sm:$0xff]  ;;  %v116_v28 = vld [vmem:[#allocation7 + $0x20] sm:$0xff] }
  0x18   :  { %136 = vmatpush.msra.mxu1 %v123_v21  ;;  %v115_v29 = vld [vmem:[#allocation7 + $0x18] sm:$0xff]  ;;  %v114_v30 = vld [vmem:[#allocation7 + $0x10] sm:$0xff]  ;;  %v113_v31 = vld [vmem:[#allocation7 + $0x8] sm:$0xff] }
  0x19   :  { %92 = vmatpush.msra.mxu0 %v77_v8  ;;  %v112_v32 = vld [vmem:[#allocation7] sm:$0xff]  ;;  %v177_v33 = vld [vmem:[%s341_s2] ss:$0 sm:$0xff]  ;;  %s160_s2 = sshll.u32 %s344_s5, 4  ;;  %s161_s2 = int_to_ptr.hbm [resolvable:$true] %s160_s2 }
  0x1a   :  { %137 = vmatpush.msra.mxu1 %v122_v22  ;;  %v178_v41 = vld [vmem:[%s343_s4] ss:$0 sm:$0xff] }
  0x1b   :  { %93 = vmatpush.msra.mxu0 %v76_v10 }
  0x1c   :  { %138 = vmatpush.msra.mxu1 %v121_v23 }
  0x1d   :  { %94 = vmatpush.msra.mxu0 %v75_v11 }
  0x1e   :  { %139 = vmatpush.msra.mxu1 %v120_v24 }
  0x1f   :  { %95 = vmatpush.msra.mxu0 %v74_v12 }
  0x20   :  { %140 = vmatpush.msra.mxu1 %v119_v25 }
  0x21   :  { %96 = vmatpush.msra.mxu0 %v73_v13 }
  0x22   :  { %141 = vmatpush.msra.mxu1 %v118_v26 }
  0x23   :  { %97 = vmatpush.msra.mxu0 %v72_v14 }
  0x24   :  { %142 = vmatpush.msra.mxu1 %v117_v27 }
  0x25   :  { %98 = vmatpush.msra.mxu0 %v71_v15 }
  0x26   :  { %143 = vmatpush.msra.mxu1 %v116_v28 }
  0x27   :  { %99 = vmatpush.msra.mxu0 %v70_v16 }
  0x28   :  { %144 = vmatpush.msra.mxu1 %v115_v29 }
  0x29   :  { %100 = vmatpush.msra.mxu0 %v69_v17 }
  0x2a   :  { %145 = vmatpush.msra.mxu1 %v114_v30 }
  0x2b   :  { %101 = vmatpush.msra.mxu0 %v68_v18 }
  0x2c   :  { %146 = vmatpush.msra.mxu1 %v113_v31 }
  0x2d   :  { %102 = vmatpush.msra.mxu0 %v67_v19 }
  0x2e   :  { %103 = vmatmul.f32.vlgmr.msra.gmra.mxu0 %v66_v20  ;;  %147 = vmatpush.msra.mxu1 %v112_v32 }
  0xab   :  { %v104_v34 = vpop.f32.mrf.mxu0 }
  0xac   :  { %v105_v35 = vadd.f32 %v177_v33, %v104_v34 }
  0xae   :  { %v107_v36 = vsub.f32 0.0, %v105_v35 }
  0xb0   :  { %v108_v37 = vmul.f32 1.442695, %v107_v36 }
  0xb2   :  { %179 = vpow2.f32 %v108_v37 }
  0xb8   :  { %v180_v38 = vpop.eup %179 }
  0xb9   :  { %v110_v39 = vadd.f32 1.0, %v180_v38 }
  0xbb   :  { %181 = vrcp.f32 %v110_v39 }
  0xc1   :  { %v182_v40 = vpop.eup %181 }
  0xc2   :  { %148 = vmatmul.f32.vlgmr.msra.gmra.mxu1 %v182_v40 }
 0x13f   :  { %v149_v42 = vpop.f32.mrf.mxu1 }
 0x140   :  { %v150_v43 = vadd.f32 %v178_v41, %v149_v42 }
 0x142   :  { %152 = vst [vmem:[#allocation8] sm:$0xff] %v150_v43 }
 0x143   :  { %163 = dma.vmem_to_hbm [thread:$0]  %s159_s12, 128, %s161_s2, [#allocation4]  }
 0x144   :  { %283 = dma.done.wait [#allocation4], 128  }
 0x145   :  { %284 = vsyncadd [#allocation4], 4294967168 }
 0x146   :  { %168 = vsyncpa [#allocation3], 1 }
 0x147   :  { %169 = vsyncpa [#allocation6], 1 }
 0x148   :  { %170 = vsyncpa [#allocation4], 1 }

</bundles_post_ra>
